<compile_context>
chip_gen: v5e
topology: v5e:2x2
jax: 0.10.0
libtpu: 0.0.40
codegen_flags: <defaults>
</compile_context>

<pallas_src>
import functools

import jax
import jax.numpy as jnp
from jax.experimental import pallas as pl
from jax.experimental.pallas import tpu as pltpu

_LANE = 128
_SUBLANE = 8
_TB_MAX = 2048                      # per-step batch-tile cap (review: 2048-4096)
_VMEM_CEIL = 64 * 1024 * 1024       # portable ceiling (v7x physical VMEM = 64 MiB)


def _round_up(x, m):
    return (x + m - 1) // m * m


def _cdiv(a, b):
    return -(-a // b)


def _fused_mlp_kernel(num_layers, x_ref, scale_ref, shift_ref, *args):
    """x -> BN0(affine) -> [SiLU -> Linear_i]*num_layers (BN_{i>=1} pre-folded)."""
    o_ref = args[2 * num_layers]
    # Activations may stream in f32 or bf16; elementwise math stays f32.
    h = x_ref[...].astype(jnp.float32)                 # (TB, D0)
    h = h * scale_ref[...] + shift_ref[...]            # stage-0 BatchNorm (eval)
    for i in range(num_layers):                        # static unroll over layers
        w_ref = args[2 * i]                            # (K, N) bf16, BN-folded
        b_ref = args[2 * i + 1]                        # (1, N) f32,  BN-folded
        h = h * jax.nn.sigmoid(h)                      # SiLU; Dropout(p=0)=identity
        h = jnp.dot(h.astype(w_ref.dtype), w_ref[...],
                    preferred_element_type=jnp.float32) + b_ref[...]
    o_ref[...] = h                                     # lane-dense f32 store


def _fused_mlp_forward(x, scale0, shift0, weights, biases, tb, vmem_limit_bytes):
    """Single fused pallas_call over batch tiles; parameters are VMEM-resident."""
    b_pad, d0 = x.shape
    num_layers = len(weights)
    d_last = weights[-1].shape[1]

    def resident(shape):
        # Grid-invariant operand: same block every step -> single-buffer it.
        return pl.BlockSpec(shape, lambda i: (0, 0), pipeline_mode=pl.Buffered(1))

    in_specs = [
        pl.BlockSpec((tb, d0), lambda i: (i, 0)),      # x: streamed batch tiles
        resident((1, d0)),                             # scale0 (unpadded feature dim)
        resident((1, d0)),                             # shift0
    ]
    flat_params = []
    for w, b in zip(weights, biases):
        in_specs.append(resident(w.shape))             # weight: resident
        in_specs.append(resident(b.shape))             # bias:   resident
        flat_params += [w, b]

    return pl.pallas_call(
        functools.partial(_fused_mlp_kernel, num_layers),
        out_shape=jax.ShapeDtypeStruct((b_pad, d_last), jnp.float32),
        grid=(b_pad // tb,),
        in_specs=in_specs,
        out_specs=pl.BlockSpec((tb, d_last), lambda i: (i, 0)),
        compiler_params=pltpu.CompilerParams(
            dimension_semantics=("parallel",),         # batch tiles independent
            vmem_limit_bytes=vmem_limit_bytes),
    )(x, scale0, shift0, *flat_params)


class PallasMLP:
    """Mirror of the PyTorch MLP (eval mode) with deterministic synthetic params."""

    def __init__(self, dim_list, batch_norm, dropout, momentum, key,
                 weight_dtype=jnp.bfloat16):
        del momentum  # only affects running-stat updates, not the eval forward
        assert dropout == 0.0, "eval/identity dropout only"
        eps = 1e-5
        self.dim_list = list(dim_list)
        self.batch_norm = batch_norm
        num_layers = len(dim_list) - 1
        # Input feature dim stays unpadded in HBM; hidden/output dims padded to 128.
        self._padded_dims = [dim_list[0]] + [_round_up(d, _LANE) for d in dim_list[1:]]

        # ----- raw per-stage parameters (PyTorch init conventions), all f32 -----
        scales, shifts, raw_w, raw_b = [], [], [], []
        for d_in, d_out in zip(dim_list[:-1], dim_list[1:]):
            key, kw, kb = jax.random.split(key, 3)
            # kaiming_uniform_ (a=0, fan_in, leaky_relu gain): bound = sqrt(6/fan_in)
            bound_w = (6.0 / d_in) ** 0.5
            raw_w.append(jax.random.uniform(kw, (d_out, d_in), jnp.float32,
                                            minval=-bound_w, maxval=bound_w))
            # default nn.Linear bias init: U(-1/sqrt(fan_in), 1/sqrt(fan_in))
            bound_b = 1.0 / (d_in ** 0.5)
            raw_b.append(jax.random.uniform(kb, (d_out,), jnp.float32,
                                            minval=-bound_b, maxval=bound_b))
            if batch_norm:
                gamma = jnp.ones((d_in,), jnp.float32)
                beta = jnp.zeros((d_in,), jnp.float32)
                run_mean = jnp.zeros((d_in,), jnp.float32)
                run_var = jnp.ones((d_in,), jnp.float32)
                scale = gamma / jnp.sqrt(run_var + eps)
                shift = beta - run_mean * scale
            else:
                scale = jnp.ones((d_in,), jnp.float32)
                shift = jnp.zeros((d_in,), jnp.float32)
            scales.append(scale)
            shifts.append(shift)

        # ----- fold BN that follows Linear_i into Linear_i -----
        folded_w, folded_b = [], []
        for i in range(num_layers):
            w_t = raw_w[i].T                            # (d_in, d_out)
            b = raw_b[i]
            if batch_norm and i + 1 < num_layers:
                s_next, sh_next = scales[i + 1], shifts[i + 1]
                w_t = w_t * s_next[None, :]
                b = b * s_next + sh_next
            folded_w.append(w_t)
            folded_b.append(b)

        scale0, shift0 = scales[0], shifts[0]

        # ----- padded kernel operands (zeros in padding keep padded lanes at 0) -----
        d0 = dim_list[0]
        self.scale0 = scale0.reshape(1, d0).astype(jnp.float32)
        self.shift0 = shift0.reshape(1, d0).astype(jnp.float32)
        self.weights, self.biases = [], []
        for i, (w_t, b) in enumerate(zip(folded_w, folded_b)):
            di, do = dim_list[i], dim_list[i + 1]
            dip, dop = self._padded_dims[i], self._padded_dims[i + 1]
            w_pad = jnp.zeros((dip, dop), jnp.float32).at[:di, :do].set(w_t)
            self.weights.append(w_pad.astype(weight_dtype))
            self.biases.append(jnp.zeros((1, dop), jnp.float32).at[0, :do].set(b))

        # ----- resident-parameter VMEM budget (single-buffered via Buffered(1)) -----
        self._resident_param_bytes = int(
            sum(int(w.size) * w.dtype.itemsize for w in self.weights)
            + sum(int(b.size) * b.dtype.itemsize for b in self.biases)
            + int(self.scale0.size) * 4 + int(self.shift0.size) * 4)
        if self._resident_param_bytes > int(0.7 * _VMEM_CEIL):
            # TODO(synk): stream oversized layer weights with an extra
            # 'arbitrary' K/N grid axis + f32 accumulator instead of keeping
            # every layer resident (needed for very large dim_lists on v7x).
            raise NotImplementedError(
                "folded weights (%d MiB) exceed the resident-VMEM budget"
                % (self._resident_param_bytes >> 20))

        # ----- unpadded copies for references -----
        self._ref_scale0, self._ref_shift0 = scale0, shift0
        self._ref_weights = [w.astype(weight_dtype) for w in folded_w]
        self._ref_biases = folded_b
        self._module_params = [
            dict(scale=scales[i], shift=shifts[i], w_t=raw_w[i].T, b=raw_b[i])
            for i in range(num_layers)
        ]

    def _vmem_limit_bytes(self, tb, x_itemsize):
        d0 = self.dim_list[0]
        d_last_pad = self._padded_dims[-1]
        max_dpad = max(self._padded_dims)
        tile_bytes = (2 * tb * d0 * x_itemsize       # double-buffered input tiles
                      + 2 * tb * d_last_pad * 4      # double-buffered output tiles
                      + 4 * tb * max_dpad * 4)       # in-flight activations / temps
        total = tile_bytes + self._resident_param_bytes + (8 << 20)  # headroom
        return int(min(max(total, 32 << 20), _VMEM_CEIL))

    @functools.partial(jax.jit, static_argnums=0)
    def __call__(self, x):
        B, D0 = x.shape
        assert D0 == self.dim_list[0]

        # Batch tiling: bound last-tile padding to one sublane group, amortize
        # the ~0.35us/step cost with large tiles, and give v7x's two
        # TensorCores >= 2 parallel grid steps whenever the batch allows it.
        n_tiles = _cdiv(B, _TB_MAX)
        if n_tiles == 1 and B >= 2 * _SUBLANE:
            n_tiles = 2
        tb = _round_up(_cdiv(B, n_tiles), _SUBLANE)
        b_pad = tb * n_tiles

        if b_pad == B:
            x_in = x                                  # no staging copy at all
        else:
            # A pad copy is unavoidable -> emit it in bf16 so both the staged
            # write and the kernel's input DMA are half-size (upcast in VMEM).
            x_in = jnp.zeros((b_pad, D0), jnp.bfloat16).at[:B].set(
                x.astype(jnp.bfloat16))

        vmem_limit = self._vmem_limit_bytes(tb, x_in.dtype.itemsize)
        out_pad = _fused_mlp_forward(x_in, self.scale0, self.shift0,
                                     tuple(self.weights), tuple(self.biases),
                                     tb, vmem_limit)
        return out_pad[:B, :self.dim_list[-1]]

    def reference_fused(self, x, x_dtype=jnp.float32):
        """Pure-JAX mirror of the exact kernel arithmetic (folded bf16 weights)."""
        h = x.astype(x_dtype).astype(jnp.float32)
        h = h * self._ref_scale0 + self._ref_shift0
        for w, b in zip(self._ref_weights, self._ref_biases):
            h = h * jax.nn.sigmoid(h)
            h = jnp.dot(h.astype(w.dtype), w,
                        preferred_element_type=jnp.float32) + b
        return h

    def reference_module(self, x):
        """Eval-mode forward of the original PyTorch module, unfolded, pure f32."""
        h = x.astype(jnp.float32)
        for p in self._module_params:
            h = h * p["scale"] + p["shift"]            # BatchNorm1d (eval)
            h = h * jax.nn.sigmoid(h)                  # SiLU; Dropout(p=0) = identity
            h = h @ p["w_t"] + p["b"]                  # Linear
        return h


if __name__ == "__main__":
    dim_list = [32, 64, 16]  # MLP(dim_list, batch_norm=True, dropout=0.0, momentum=0.1)
    model = PallasMLP(dim_list, batch_norm=True, dropout=0.0, momentum=0.1,
                      key=jax.random.PRNGKey(1))

    # --- small aligned batch: f32 input, no staging copy, grid=(1,) ---
    x = jax.random.normal(jax.random.PRNGKey(0), (8, dim_list[0]), jnp.float32)
    out = jax.block_until_ready(model(x))
    assert out.shape == (8, dim_list[-1])
    assert jnp.allclose(out, model.reference_fused(x), atol=1e-2, rtol=1e-2), \
        "mismatch vs fused ref (aligned batch)"
    assert jnp.allclose(out, model.reference_module(x), atol=5e-2, rtol=5e-2), \
        "mismatch vs module ref (aligned batch)"

    # --- ragged batch: bf16 staging pad, 2 parallel batch tiles ---
    x2 = jax.random.normal(jax.random.PRNGKey(2), (300, dim_list[0]), jnp.float32)
    out2 = jax.block_until_ready(model(x2))
    assert out2.shape == (300, dim_list[-1])
    assert jnp.allclose(out2, model.reference_fused(x2, x_dtype=jnp.bfloat16),
                        atol=2e-2, rtol=2e-2), "mismatch vs fused ref (ragged batch)"
    assert jnp.allclose(out2, model.reference_module(x2), atol=1e-1, rtol=1e-1), \
        "mismatch vs module ref (ragged batch)"

    print("KERNEL_OK")
</pallas_src>

<mosaic_0001>
module attributes {stable_mosaic.version = 11 : i64} {
  func.func @_fused_mlp_kernel(%arg0: i32, %arg1: memref<8x32xf32, #tpu.memory_space<vmem>>, %arg2: memref<1x32xf32, #tpu.memory_space<vmem>>, %arg3: memref<1x32xf32, #tpu.memory_space<vmem>>, %arg4: memref<32x128xbf16, #tpu.memory_space<vmem>>, %arg5: memref<1x128xf32, #tpu.memory_space<vmem>>, %arg6: memref<128x128xbf16, #tpu.memory_space<vmem>>, %arg7: memref<1x128xf32, #tpu.memory_space<vmem>>, %arg8: memref<8x128xf32, #tpu.memory_space<vmem>>) attributes {dimension_semantics = [#tpu.dimension_semantics<parallel>], iteration_bounds = array<i64: 1>, scalar_prefetch = 0 : i64, scratch_operands = 0 : i64, tpu.core_type = #tpu.core_type<tc>, window_params = [{transform_indices = @transform_0, window_bounds = array<i64: 8, 32>}, {pipeline_mode = #tpu.pipeline_mode<synchronous>, transform_indices = @transform_1, window_bounds = array<i64: 1, 32>}, {pipeline_mode = #tpu.pipeline_mode<synchronous>, transform_indices = @transform_2, window_bounds = array<i64: 1, 32>}, {pipeline_mode = #tpu.pipeline_mode<synchronous>, transform_indices = @transform_3, window_bounds = array<i64: 32, 128>}, {pipeline_mode = #tpu.pipeline_mode<synchronous>, transform_indices = @transform_4, window_bounds = array<i64: 1, 128>}, {pipeline_mode = #tpu.pipeline_mode<synchronous>, transform_indices = @transform_5, window_bounds = array<i64: 128, 128>}, {pipeline_mode = #tpu.pipeline_mode<synchronous>, transform_indices = @transform_6, window_bounds = array<i64: 1, 128>}, {transform_indices = @transform_7, window_bounds = array<i64: 8, 128>}]} {
    %c0 = arith.constant 0 : index
    %c0_0 = arith.constant 0 : index
    %0 = vector.load %arg1[%c0, %c0_0] : memref<8x32xf32, #tpu.memory_space<vmem>>, vector<8x32xf32>
    %c0_1 = arith.constant 0 : index
    %c0_2 = arith.constant 0 : index
    %1 = vector.load %arg2[%c0_1, %c0_2] : memref<1x32xf32, #tpu.memory_space<vmem>>, vector<1x32xf32>
    %2 = vector.broadcast %1 : vector<1x32xf32> to vector<8x32xf32>
    %3 = arith.mulf %0, %2 : vector<8x32xf32>
    %c0_3 = arith.constant 0 : index
    %c0_4 = arith.constant 0 : index
    %4 = vector.load %arg3[%c0_3, %c0_4] : memref<1x32xf32, #tpu.memory_space<vmem>>, vector<1x32xf32>
    %5 = vector.broadcast %4 : vector<1x32xf32> to vector<8x32xf32>
    %6 = arith.addf %3, %5 : vector<8x32xf32>
    %7 = arith.negf %6 : vector<8x32xf32>
    %8 = math.exp %7 : vector<8x32xf32>
    %cst = arith.constant 1.000000e+00 : f32
    %9 = vector.broadcast %cst : f32 to vector<8x32xf32>
    %10 = arith.addf %9, %8 : vector<8x32xf32>
    %11 = arith.divf %9, %10 : vector<8x32xf32>
    %12 = arith.mulf %6, %11 : vector<8x32xf32>
    %13 = arith.truncf %12 : vector<8x32xf32> to vector<8x32xbf16>
    %c0_5 = arith.constant 0 : index
    %c0_6 = arith.constant 0 : index
    %14 = vector.load %arg4[%c0_5, %c0_6] : memref<32x128xbf16, #tpu.memory_space<vmem>>, vector<32x128xbf16>
    %cst_7 = arith.constant dense<0.000000e+00> : vector<8x128xf32>
    %15 = tpu.matmul %13, %14, %cst_7 {dimension_numbers = #tpu.dot_dimension_numbers<[1], [0], [0], [1], [0, 0, 1, 1], [], []>} : vector<8x32xbf16>, vector<32x128xbf16>, vector<8x128xf32> -> vector<8x128xf32>
    %c0_8 = arith.constant 0 : index
    %c0_9 = arith.constant 0 : index
    %16 = vector.load %arg5[%c0_8, %c0_9] : memref<1x128xf32, #tpu.memory_space<vmem>>, vector<1x128xf32>
    %17 = vector.broadcast %16 : vector<1x128xf32> to vector<8x128xf32>
    %18 = arith.addf %15, %17 : vector<8x128xf32>
    %19 = arith.negf %18 : vector<8x128xf32>
    %20 = math.exp %19 : vector<8x128xf32>
    %cst_10 = arith.constant 1.000000e+00 : f32
    %21 = vector.broadcast %cst_10 : f32 to vector<8x128xf32>
    %22 = arith.addf %21, %20 : vector<8x128xf32>
    %23 = arith.divf %21, %22 : vector<8x128xf32>
    %24 = arith.mulf %18, %23 : vector<8x128xf32>
    %25 = arith.truncf %24 : vector<8x128xf32> to vector<8x128xbf16>
    %c0_11 = arith.constant 0 : index
    %c0_12 = arith.constant 0 : index
    %26 = vector.load %arg6[%c0_11, %c0_12] : memref<128x128xbf16, #tpu.memory_space<vmem>>, vector<128x128xbf16>
    %cst_13 = arith.constant dense<0.000000e+00> : vector<8x128xf32>
    %27 = tpu.matmul %25, %26, %cst_13 {dimension_numbers = #tpu.dot_dimension_numbers<[1], [0], [0], [1], [0, 0, 1, 1], [], []>} : vector<8x128xbf16>, vector<128x128xbf16>, vector<8x128xf32> -> vector<8x128xf32>
    %c0_14 = arith.constant 0 : index
    %c0_15 = arith.constant 0 : index
    %28 = vector.load %arg7[%c0_14, %c0_15] : memref<1x128xf32, #tpu.memory_space<vmem>>, vector<1x128xf32>
    %29 = vector.broadcast %28 : vector<1x128xf32> to vector<8x128xf32>
    %30 = arith.addf %27, %29 : vector<8x128xf32>
    %c0_16 = arith.constant 0 : index
    %c0_17 = arith.constant 0 : index
    %31 = vector.load %arg8[%c0_16, %c0_17] : memref<8x128xf32, #tpu.memory_space<vmem>>, vector<8x128xf32>
    tpu.vector_store %arg8[%c0_16, %c0_17], %30 {strides = array<i32>} : memref<8x128xf32, #tpu.memory_space<vmem>>, vector<8x128xf32>,
    return
  }
  func.func @transform_0(%arg0: i32) -> (i32, i32) {
    %c0_i32 = arith.constant 0 : i32
    %c0_i32_0 = arith.constant 0 : i32
    return %arg0, %c0_i32 : i32, i32
  }
  func.func @transform_1(%arg0: i32) -> (i32, i32) {
    %c0_i32 = arith.constant 0 : i32
    %c0_i32_0 = arith.constant 0 : i32
    %c0_i32_1 = arith.constant 0 : i32
    return %c0_i32, %c0_i32_0 : i32, i32
  }
  func.func @transform_2(%arg0: i32) -> (i32, i32) {
    %c0_i32 = arith.constant 0 : i32
    %c0_i32_0 = arith.constant 0 : i32
    %c0_i32_1 = arith.constant 0 : i32
    return %c0_i32, %c0_i32_0 : i32, i32
  }
  func.func @transform_3(%arg0: i32) -> (i32, i32) {
    %c0_i32 = arith.constant 0 : i32
    %c0_i32_0 = arith.constant 0 : i32
    %c0_i32_1 = arith.constant 0 : i32
    return %c0_i32, %c0_i32_0 : i32, i32
  }
  func.func @transform_4(%arg0: i32) -> (i32, i32) {
    %c0_i32 = arith.constant 0 : i32
    %c0_i32_0 = arith.constant 0 : i32
    %c0_i32_1 = arith.constant 0 : i32
    return %c0_i32, %c0_i32_0 : i32, i32
  }
  func.func @transform_5(%arg0: i32) -> (i32, i32) {
    %c0_i32 = arith.constant 0 : i32
    %c0_i32_0 = arith.constant 0 : i32
    %c0_i32_1 = arith.constant 0 : i32
    return %c0_i32, %c0_i32_0 : i32, i32
  }
  func.func @transform_6(%arg0: i32) -> (i32, i32) {
    %c0_i32 = arith.constant 0 : i32
    %c0_i32_0 = arith.constant 0 : i32
    %c0_i32_1 = arith.constant 0 : i32
    return %c0_i32, %c0_i32_0 : i32, i32
  }
  func.func @transform_7(%arg0: i32) -> (i32, i32) {
    %c0_i32 = arith.constant 0 : i32
    %c0_i32_0 = arith.constant 0 : i32
    return %arg0, %c0_i32 : i32, i32
  }
}

</mosaic_0001>

<bundles_post_ra>
// kernel: a_call__.1
= control target key start
LH: loop header
LB: loop body
LE: loop exit
PB: predicated region body
PF: predicated region fallthrough
CT: control target
= control target key end

     0   :  { %12 = vsyncpa [#allocation3], 0  ;;  %s506_s0 = inlined_call_operand.hbm [shape: f32[8,32], index: 0, kind: input, shape index: {}]   ;;  %s507_s1 = inlined_call_operand.vmem [shape: f32[1,32], index: 1, kind: input, shape index: {}]   ;;  %s508_s2 = inlined_call_operand.vmem [shape: f32[1,32], index: 2, kind: input, shape index: {}]   ;;  %s509_s3 = inlined_call_operand.hbm [shape: bf16[32,128], index: 3, kind: input, shape index: {}]   ;;  %s510_s4 = inlined_call_operand.vmem [shape: f32[1,128], index: 4, kind: input, shape index: {}]   ;;  %s511_s5 = inlined_call_operand.hbm [shape: bf16[128,128], index: 5, kind: input, shape index: {}]   ;;  %s512_s6 = inlined_call_operand.vmem [shape: f32[1,128], index: 6, kind: input, shape index: {}]   ;;  %s513_s7 = inlined_call_operand.hbm [shape: f32[8,128], index: 7, kind: output, shape index: {}]  }
   0x1   :  { %13 = vsyncpa [#allocation6], 0  ;;  %s34_s26 = sshll.u32 %s509_s3, 4  ;;  %s35_s26 = int_to_ptr.hbm [resolvable:$true] %s34_s26 }
   0x2   :  { %14 = vsyncpa [#allocation4], 0  ;;  %s436_s27 = smov [#allocation5]   ;;  %s20_s8 = sshll.u32 %s506_s0, 4  ;;  %s21_s8 = int_to_ptr.hbm [resolvable:$true] %s20_s8 }
   0x3   :  { %s36_s28 = sshll.u32 %s436_s27, 4  ;;  %s437_s9 = smov 64   ;;  %s37_s28 = int_to_ptr.vmem [resolvable:$true] %s36_s28 }
   0x4   :  { %s438_s10 = smov 4   ;;  %s439_s11 = smov [#allocation2]  }
   0x5   :  { %42 = dma.hbm_to_vmem [thread:$0]  %s35_s26, 256, %s37_s28, [#allocation6], %s437_s9, %s437_s9, %s438_s10  }
   0x6   :  { %s22_s12 = sshll.u32 %s439_s11, 4  ;;  %s49_s15 = sshll.u32 %s511_s5, 4  ;;  %s23_s12 = int_to_ptr.vmem [resolvable:$true] %s22_s12  ;;  %s50_s15 = int_to_ptr.hbm [resolvable:$true] %s49_s15 }
   0x7   :  { %25 = dma.hbm_to_vmem [thread:$0]  %s21_s8, 128, %s23_s12, [#allocation3]  }
   0x8   :  { %s440_s3 = smov [#allocation7]  }
   0x9   :  { %s51_s16 = sshll.u32 %s440_s3, 4  ;;  %s52_s16 = int_to_ptr.vmem [resolvable:$true] %s51_s16 }
   0xa   :  { %57 = dma.hbm_to_vmem [thread:$0]  %s50_s15, 1024, %s52_s16, [#allocation6], %s437_s9, %s437_s9, %s438_s10  }
   0xb   :  { %430 = dma.done.wait [#allocation3], 128  }
   0xc   :  { %431 = vsyncadd [#allocation3], 4294967168 }
   0xd   :  { %432 = dma.done.wait [#allocation6], 1280  }
   0xe   :  { %433 = vsyncadd [#allocation6], 4294966016  ;;  %v307_v0 = vld [vmem:[#allocation5 + $0x8] sm:$0xff]  ;;  %v306_v1 = vld [vmem:[#allocation5] sm:$0xff]  ;;  %vm125_vm4 = vcmask 261120   ;;  %s441_s20 = smov [#allocation8]  }
   0xf   :  { %v73_v2 = vld [vmem:[#allocation2] sm:$0xff]  ;;  %135 = vmatpush.bf16.msra.mxu0 %v307_v0  ;;  %v315_v22 = vld [vmem:[#allocation7 + $0x38] sm:$0xff]  ;;  %v314_v23 = vld [vmem:[#allocation7 + $0x30] sm:$0xff]  ;;  %s250_s21 = sshll.u32 %s441_s20, 4  ;;  %s252_s24 = sshll.u32 %s513_s7, 4  ;;  %s251_s21 = int_to_ptr.vmem [resolvable:$true] %s250_s21  ;;  %s253_s24 = int_to_ptr.hbm [resolvable:$true] %s252_s24 }
  0x10   :  { %v322_v3 = vld [vmem:[%s507_s1] ss:$0 sm:$0xff]  ;;  %231 = vmatpush.bf16.msra.mxu1 %v315_v22  ;;  %v312_v25 = vld [vmem:[#allocation7 + $0x20] sm:$0xff]  ;;  %v311_v26 = vld [vmem:[#allocation7 + $0x18] sm:$0xff] }
  0x11   :  { %v323_v4 = vld [vmem:[%s508_s2] ss:$0 sm:$0xff]  ;;  %v78_v5 = vmul.f32 %v322_v3, %v73_v2  ;;  %v310_v27 = vld [vmem:[#allocation7 + $0x10] sm:$0xff]  ;;  %v308_v29 = vld [vmem:[#allocation7] sm:$0xff] }
  0x12   :  { %v313_v24 = vld [vmem:[#allocation7 + $0x28] sm:$0xff] }
  0x13   :  { %v83_v6 = vadd.f32 %v323_v4, %v78_v5  ;;  %136 = vmatpush.bf16.msra.mxu0 %v306_v1  ;;  %v309_v28 = vld [vmem:[#allocation7 + $0x8] sm:$0xff] }
  0x14   :  { %232 = vmatpush.bf16.msra.mxu1 %v314_v23  ;;  %v324_v30 = vld [vmem:[%s510_s4] ss:$0 sm:$0xff] }
  0x15   :  { %v263_v7 = vmul.f32 -1.442695, %v83_v6  ;;  %v325_v49 = vld [vmem:[%s512_s6] ss:$0 sm:$0xff] }
  0x17   :  { %326 = vpow2.f32 %v263_v7 }
  0x18   :  { %233 = vmatpush.bf16.msra.mxu1 %v313_v24 }
  0x1c   :  { %234 = vmatpush.bf16.msra.mxu1 %v312_v25 }
  0x1d   :  { %v327_v8 = vpop.eup %326 }
  0x1e   :  { %v87_v9 = vadd.f32 1.0, %v327_v8 }
  0x20   :  { %328 = vrcp.f32 %v87_v9  ;;  %v99_v12 = vand.u32 2147483648, %v87_v9  ;;  %vm93_vm0 = vweird.f32 %v87_v9  ;;  %v97_v14 = vand.u32 2147483647, %v87_v9  ;;  %235 = vmatpush.bf16.msra.mxu1 %v311_v26 }
  0x22   :  { %v100_v16 = vor.u32 1.1754944e-38, %v99_v12  ;;  %vm98_vm3 = vcmp.eq.f32.partialorder %v97_v14, 8.507059e+37 }
  0x24   :  { %236 = vmatpush.bf16.msra.mxu1 %v310_v27 }
  0x26   :  { %v329_v10 = vpop.eup %328 }
  0x27   :  { %v89_v11 = vmul.f32 %v329_v10, %v87_v9  ;;  %vm94_vm1 = vweird.f32 %v329_v10 }
  0x28   :  { %vm95_vm2 = vmor %vm93_vm0, %vm94_vm1  ;;  %237 = vmatpush.bf16.msra.mxu1 %v309_v28 }
  0x29   :  { %v90_v13 = vsub.f32 1.0, %v89_v11 }
  0x2b   :  { %v91_v15 = vmul.f32 %v329_v10, %v90_v13 }
  0x2c   :  { %238 = vmatpush.bf16.msra.mxu1 %v308_v29 }
  0x2d   :  { %v92_v17 = vadd.f32 %v329_v10, %v91_v15 }
  0x2f   :  { %v96_v18 = vsel %vm95_vm2, %v329_v10, %v92_v17 }
  0x30   :  { %v101_v19 = vsel %vm98_vm3, %v100_v16, %v96_v18 }
  0x31   :  { %v103_v20 = vmul.f32 %v101_v19, %v83_v6 }
  0x33   :  { %v104_v21 = vpack.c.bf16 %v103_v20, %v103_v20 }
  0x35   :  { %272 = vmatmul.msk.bf16.vlgmr.msra.gmra.mxu0 %vm125_vm4, %v104_v21 }
  0xb2   :  { %v138_v31 = vpop.f32.mrf.mxu0 }
  0xb3   :  { %v139_v32 = vadd.f32 %v324_v30, %v138_v31 }
  0xb5   :  { %v273_v33 = vmul.f32 -1.442695, %v139_v32 }
  0xb7   :  { %330 = vpow2.f32 %v273_v33 }
  0xba   :  { %v140_v34 = vpop.f32.mrf.mxu0 }
  0xbd   :  { %v331_v35 = vpop.eup %330 }
  0xbe   :  { %v145_v36 = vadd.f32 1.0, %v331_v35 }
  0xc0   :  { %332 = vrcp.f32 %v145_v36  ;;  %v157_v40 = vand.u32 2147483648, %v145_v36  ;;  %v155_v42 = vand.u32 2147483647, %v145_v36  ;;  %vm151_vm6 = vweird.f32 %v145_v36 }
  0xc2   :  { %v158_v44 = vor.u32 1.1754944e-38, %v157_v40  ;;  %vm156_vm8 = vcmp.eq.f32.partialorder %v155_v42, 8.507059e+37 }
  0xc6   :  { %v333_v37 = vpop.eup %332 }
  0xc7   :  { %v147_v38 = vmul.f32 %v333_v37, %v145_v36  ;;  %vm152_vm5 = vweird.f32 %v333_v37 }
  0xc8   :  { %vm153_vm7 = vmor %vm151_vm6, %vm152_vm5 }
  0xc9   :  { %v148_v39 = vsub.f32 1.0, %v147_v38 }
  0xcb   :  { %v149_v41 = vmul.f32 %v333_v37, %v148_v39 }
  0xcd   :  { %v150_v43 = vadd.f32 %v333_v37, %v149_v41 }
  0xcf   :  { %v154_v45 = vsel %vm153_vm7, %v333_v37, %v150_v43 }
  0xd0   :  { %v159_v46 = vsel %vm156_vm8, %v158_v44, %v154_v45 }
  0xd1   :  { %v161_v47 = vmul.f32 %v159_v46, %v139_v32 }
  0xd3   :  { %v162_v48 = vpack.c.bf16 %v161_v47, %v161_v47 }
  0xd5   :  { %239 = vmatmul.bf16.vlgmr.msra.gmra.mxu1 %v162_v48 }
 0x152   :  { %v240_v50 = vpop.f32.mrf.mxu1 }
 0x153   :  { %v241_v51 = vadd.f32 %v325_v49, %v240_v50 }
 0x155   :  { %244 = vst [vmem:[#allocation8] sm:$0xff] %v241_v51 }
 0x156   :  { %255 = dma.vmem_to_hbm [thread:$0]  %s251_s21, 128, %s253_s24, [#allocation4]  }
 0x15a   :  { %v242_v52 = vpop.f32.mrf.mxu1 }
 0x15b   :  { %434 = dma.done.wait [#allocation4], 128  }
 0x15c   :  { %435 = vsyncadd [#allocation4], 4294967168 }
 0x15d   :  { %260 = vsyncpa [#allocation3], 1 }
 0x15e   :  { %261 = vsyncpa [#allocation6], 1 }
 0x15f   :  { %262 = vsyncpa [#allocation4], 1 }

</bundles_post_ra>
